<compile_context>
chip_gen: v6e
topology: v6e:2x2x1
jax: 0.10.0
libtpu: 0.0.40
codegen_flags: <defaults>
</compile_context>

<pallas_src>
import functools

import jax
import jax.numpy as jnp
from jax import lax
from jax.experimental import pallas as pl
from jax.experimental.pallas import tpu as pltpu


def _round_up(n, m):
    return ((n + m - 1) // m) * m


def _largest_divisor_tile(total, granularity, cap):
    """Largest multiple of `granularity` that divides `total` and is <= cap."""
    cap = max(granularity, min(cap, total))
    best = granularity
    t = granularity
    while t <= cap:
        if total % t == 0:
            best = t
        t += granularity
    return best


def _vmem_limit_bytes():
    """Scoped-VMEM budget: ~3/4 of physical capacity, capped at 100 MiB.

    v5e/v6e (128 MiB physical) -> ~96 MiB; v7x (64 MiB) or unknown -> 48 MiB.
    """
    cap = 64 * 1024 * 1024  # conservative default (v7x per-TC VMEM)
    try:
        info = pltpu.get_tpu_info()
        c = getattr(info, "vmem_capacity_bytes", None)
        if c:
            cap = int(c)
    except Exception:
        pass
    return max(32 * 1024 * 1024, min((cap * 3) // 4, 100 * 1024 * 1024))


def _lowrank_kernel(x_ref, wqk_ref, o_ref, q_scr, k_scr, *, dh, tm, tn):
    # x_ref  : (1, n_x_pad, D)       -- current batch element (resident across h/i/j)
    # wqk_ref: (H, D, 2*dh)          -- all heads' fused [wq*scaling | wk] weights (resident)
    # o_ref  : (1, 1, tm, tn)        -- output score tile for (b, h, i, j)
    # q_scr  : (tm, dh) VMEM         -- q rows of the current row-tile i
    # k_scr  : (n_cols_pad, dh) VMEM -- k rows of the whole (padded) sequence
    h = pl.program_id(1)
    i = pl.program_id(2)
    j = pl.program_id(3)

    x_view = x_ref.at[0]  # (n_x_pad, D) ref view, no load

    # q rows for row-tile i: recomputed once per (b, h, i).  Spread across the tile loop
    # (instead of a per-(b,h) warm-up) so it overlaps with output writeback of earlier tiles.
    @pl.when(j == 0)
    def _project_q():
        wq = wqk_ref[h][:, :dh]                                # (D, dh), scaling folded in
        rows = pl.ds(pl.multiple_of(i * tm, tm), tm)
        q = jnp.dot(x_view[rows, :], wq, preferred_element_type=jnp.float32)
        q_scr[...] = q.astype(q_scr.dtype)

    # k rows for column-tile j: computed during the first row sweep (i == 0), reused after.
    @pl.when(i == 0)
    def _project_k():
        wk = wqk_ref[h][:, dh:]                                # (D, dh)
        rows = pl.ds(pl.multiple_of(j * tn, tn), tn)
        k = jnp.dot(x_view[rows, :], wk, preferred_element_type=jnp.float32)
        k_scr[rows, :] = k.astype(k_scr.dtype)

    # Score tile: contract the last dims directly (no k.T -> no XLU transpose), f32 MXU acc.
    k = k_scr[pl.ds(pl.multiple_of(j * tn, tn), tn), :]        # (tn, dh)
    s = lax.dot_general(q_scr[...], k,
                        dimension_numbers=(((1,), (1,)), ((), ())),
                        preferred_element_type=jnp.float32)
    o_ref[0, 0] = s.astype(o_ref.dtype)


def low_rank_kernel_forward(x, w_qk, *, heads, dim_head, scaling=1.0,
                            compute_dtype=None, out_dtype=None,
                            max_row_tile=512, max_col_tile=1024):
    """JAX/Pallas equivalent of LowRankKernel.forward.

    x    : (B, N, dim)
    w_qk : (2 * heads * dim_head, dim)  -- PyTorch nn.Linear weight layout (no bias)
    returns: (B, heads, N, N)

    Performance knobs (semantics preserved):
      compute_dtype=jnp.bfloat16 halves x / scratch traffic (f32 MXU accumulation kept).
      out_dtype=jnp.bfloat16 halves the dominant N^2 writeback bytes -- strongly
      recommended when downstream tolerates bf16 scores.
    """
    B, N, D = x.shape
    H, dh = heads, dim_head
    cdt = jnp.dtype(compute_dtype) if compute_dtype is not None else jnp.dtype(x.dtype)
    odt = jnp.dtype(out_dtype) if out_dtype is not None else jnp.dtype(x.dtype)
    cdt_size = cdt.itemsize
    odt_size = odt.itemsize

    # --- weight prep (host): per-head (D, dh) projections, scaling folded into wq,
    #     q & k fused along the output dim -> (H, D, 2*dh). -------------------------
    # PyTorch: qk = x @ W^T ; q = qk[..., :H*dh] ; rearrange 'b n (h d) -> b h n d'
    wq = w_qk[: H * dh].reshape(H, dh, D).transpose(0, 2, 1)   # (H, D, dh)
    wk = w_qk[H * dh:].reshape(H, dh, D).transpose(0, 2, 1)    # (H, D, dh)
    if float(scaling) != 1.0:
        wq = wq * jnp.asarray(scaling, wq.dtype)
    wqk = jnp.concatenate([wq, wk], axis=-1).astype(cdt)       # (H, D, 2*dh)

    # --- padding & tile selection ---------------------------------------------------
    # Columns (lane axis) pad to 128 so output stores are lane-dense / unmasked.
    # Rows (sublane axis) pad only to sublane/64 granularity -- padded rows are pure
    # wasted HBM writes in this writeback-bound kernel.
    vmem_limit = _vmem_limit_bytes()
    row_gran = 8 if odt_size >= 4 else 16
    n_cols_pad = _round_up(N, 128)
    if N <= 256:
        n_rows_pad = _round_up(N, row_gran)
    else:
        n_rows_pad = _round_up(N, 64)
    n_x_pad = max(n_rows_pad, n_cols_pad)
    lane_dh = _round_up(dh, 128)     # dh lane-pads to 128 inside VMEM scratch

    def _pick(cap_tm, cap_tn):
        tm_ = n_rows_pad if N <= 256 else _largest_divisor_tile(n_rows_pad, 64, cap_tm)
        tn_ = _largest_divisor_tile(n_cols_pad, 128, cap_tn)
        return tm_, tn_

    def _vmem_est(tm_, tn_):
        return (2 * tm_ * tn_ * odt_size                 # output tile, double-buffered
                + 2 * n_x_pad * D * cdt_size             # x block, double-buffered
                + 2 * H * D * 2 * dh * cdt_size          # weights, double-buffered
                + (tm_ + n_cols_pad) * lane_dh * cdt_size)   # q/k scratch (lane-padded)

    cap_tm, cap_tn = max_row_tile, max_col_tile
    tm, tn = _pick(cap_tm, cap_tn)
    budget = vmem_limit - (4 << 20)
    while _vmem_est(tm, tn) > budget and (cap_tn > 128 or cap_tm > 64):
        if cap_tn > 128:
            cap_tn //= 2
        else:
            cap_tm //= 2
        tm, tn = _pick(cap_tm, cap_tn)

    xp = x.astype(cdt)
    if n_x_pad != N:
        xp = jnp.pad(xp, ((0, 0), (0, n_x_pad - N), (0, 0)))

    # Advisory cost estimate: the kernel is dominated by the N^2 output writeback.
    flops = 2 * B * H * (n_rows_pad * n_cols_pad * dh
                         + (n_rows_pad + n_cols_pad) * D * dh)
    bytes_accessed = (B * H * n_rows_pad * n_cols_pad * odt_size
                      + B * n_x_pad * D * cdt_size
                      + H * D * 2 * dh * cdt_size)
    cost = pl.CostEstimate(flops=int(flops), transcendentals=0,
                           bytes_accessed=int(bytes_accessed))

    kernel = functools.partial(_lowrank_kernel, dh=dh, tm=tm, tn=tn)

    out = pl.pallas_call(
        kernel,
        out_shape=jax.ShapeDtypeStruct((B, H, n_rows_pad, n_cols_pad), odt),
        grid_spec=pltpu.PrefetchScalarGridSpec(
            num_scalar_prefetch=0,
            grid=(B, H, n_rows_pad // tm, n_cols_pad // tn),
            in_specs=[
                # x[b]: block index constant across (h, i, j) -> DMA'd once per b.
                pl.BlockSpec((1, n_x_pad, D), lambda b, h, i, j: (b, 0, 0)),
                # All heads' fused weights, fully resident in VMEM (tiny).
                pl.BlockSpec((H, D, 2 * dh), lambda b, h, i, j: (0, 0, 0)),
            ],
            out_specs=pl.BlockSpec((1, 1, tm, tn),
                                   lambda b, h, i, j: (b, h, i, j)),
            scratch_shapes=[
                pltpu.VMEM((tm, dh), cdt),           # q rows of current row-tile
                pltpu.VMEM((n_cols_pad, dh), cdt),   # k rows of whole (padded) sequence
            ],
        ),
        compiler_params=pltpu.CompilerParams(
            # b/h parallel (megacore-shardable); i/j must stay arbitrary: k/q scratch is
            # filled at i==0 / j==0 and reused across the i/j sweep within each (b,h).
            dimension_semantics=("parallel", "parallel", "arbitrary", "arbitrary"),
            vmem_limit_bytes=vmem_limit,
        ),
        cost_estimate=cost,
    )(xp, wqk)

    if n_rows_pad != N or n_cols_pad != N:
        out = out[:, :, :N, :N]
    return out


def _reference(x, w_qk, *, heads, dim_head, scaling=1.0):
    B, N, D = x.shape
    H, dh = heads, dim_head
    qk = x @ w_qk.T                                   # (B, N, 2*H*dh)
    q, k = jnp.split(qk, 2, axis=-1)                  # each (B, N, H*dh)
    q = q.reshape(B, N, H, dh).transpose(0, 2, 1, 3)  # (B, H, N, dh)
    k = k.reshape(B, N, H, dh).transpose(0, 2, 1, 3)
    return jnp.einsum('bhid,bhjd->bhij', q, k) * scaling


if __name__ == "__main__":
    key = jax.random.PRNGKey(0)
    k_x, k_w, k_x2 = jax.random.split(key, 3)

    # Small shapes consistent with the module: batch=2, seq=8, dim=32, heads=2, dim_head=16.
    B, N, dim = 2, 8, 32
    heads, dim_head = 2, 16

    x = jax.random.normal(k_x, (B, N, dim), dtype=jnp.float32)
    bound = 1.0 / float(jnp.sqrt(dim))
    w_qk = jax.random.uniform(
        k_w, (2 * heads * dim_head, dim), minval=-bound, maxval=bound,
        dtype=jnp.float32)

    # 1) Tiny-N case (rows pad to 8, columns to 128; lane-dense stores).
    out = low_rank_kernel_forward(x, w_qk, heads=heads, dim_head=dim_head, scaling=1.0)
    out = jax.block_until_ready(out)
    ref = _reference(x, w_qk, heads=heads, dim_head=dim_head, scaling=1.0)
    assert out.shape == (B, heads, N, N)
    assert jnp.allclose(out, ref, atol=1e-4, rtol=1e-4), "f32 mismatch (small N)"

    # 2) N=300 with default tiles (rows pad to 320 not 384; single big 320x384 tile per (b,h)).
    N2 = 300
    x2 = jax.random.normal(k_x2, (B, N2, dim), dtype=jnp.float32)
    out2 = low_rank_kernel_forward(x2, w_qk, heads=heads, dim_head=dim_head, scaling=0.5)
    out2 = jax.block_until_ready(out2)
    ref2 = _reference(x2, w_qk, heads=heads, dim_head=dim_head, scaling=0.5)
    assert out2.shape == (B, heads, N2, N2)
    assert jnp.allclose(out2, ref2, atol=1e-4, rtol=1e-4), "f32 mismatch (N=300, big tile)"

    # 3) Same N=300 but with small tile caps to exercise the spread-projection multi-tile
    #    path (grid (B, H, 5, 3): q projected at j==0 per row-tile, k at i==0 per col-tile).
    out2b = low_rank_kernel_forward(x2, w_qk, heads=heads, dim_head=dim_head, scaling=0.5,
                                    max_row_tile=64, max_col_tile=128)
    out2b = jax.block_until_ready(out2b)
    assert out2b.shape == (B, heads, N2, N2)
    assert jnp.allclose(out2b, ref2, atol=1e-4, rtol=1e-4), "f32 mismatch (N=300, multi-tile)"

    # 4) bf16 compute path (f32 accumulation, f32 output) with looser tolerance.
    out3 = low_rank_kernel_forward(x2, w_qk, heads=heads, dim_head=dim_head,
                                   scaling=0.5, compute_dtype=jnp.bfloat16)
    out3 = jax.block_until_ready(out3)
    assert out3.shape == (B, heads, N2, N2)
    assert jnp.allclose(out3.astype(jnp.float32), ref2, atol=1e-1, rtol=1e-1), \
        "bf16 compute mismatch"

    # 5) bf16 output path (recommended production path: halves the dominant writeback bytes).
    out4 = low_rank_kernel_forward(x2, w_qk, heads=heads, dim_head=dim_head,
                                   scaling=0.5, out_dtype=jnp.bfloat16)
    out4 = jax.block_until_ready(out4)
    assert out4.shape == (B, heads, N2, N2)
    assert out4.dtype == jnp.bfloat16
    assert jnp.allclose(out4.astype(jnp.float32), ref2, atol=1e-1, rtol=1e-1), \
        "bf16 output mismatch"

    print("KERNEL_OK")
</pallas_src>

<mosaic_0001>
module attributes {stable_mosaic.version = 11 : i64} {
  func.func @_lowrank_kernel(%arg0: i32, %arg1: i32, %arg2: i32, %arg3: i32, %arg4: memref<1x128x32xf32, #tpu.memory_space<vmem>>, %arg5: memref<2x32x32xf32, #tpu.memory_space<vmem>>, %arg6: memref<1x1x8x128xf32, #tpu.memory_space<vmem>>, %arg7: memref<8x16xf32, #tpu.memory_space<vmem>>, %arg8: memref<128x16xf32, #tpu.memory_space<vmem>>) attributes {dimension_semantics = [#tpu.dimension_semantics<parallel>, #tpu.dimension_semantics<parallel>, #tpu.dimension_semantics<arbitrary>, #tpu.dimension_semantics<arbitrary>], iteration_bounds = array<i64: 2, 2, 1, 1>, scalar_prefetch = 0 : i64, scratch_operands = 2 : i64, tpu.core_type = #tpu.core_type<tc>, window_params = [{transform_indices = @transform_0, window_bounds = array<i64: 1, 128, 32>}, {pipeline_mode = #tpu.pipeline_mode<synchronous>, transform_indices = @transform_1, window_bounds = array<i64: 2, 32, 32>}, {transform_indices = @transform_2, window_bounds = array<i64: 1, 1, 8, 128>}]} {
    %c0_i32 = arith.constant 0 : i32
    %0 = arith.cmpi eq, %arg3, %c0_i32 : i32
    %1 = arith.extui %0 : i1 to i32
    %c0_i32_0 = arith.constant 0 : i32
    %c0_i32_1 = arith.constant 0 : i32
    %2 = arith.cmpi ne, %1, %c0_i32_1 : i32
    scf.if %2 {
      %15 = arith.index_cast %arg1 : i32 to index
      %c0_11 = arith.constant 0 : index
      %c0_12 = arith.constant 0 : index
      %16 = vector.load %arg5[%15, %c0_11, %c0_12] : memref<2x32x32xf32, #tpu.memory_space<vmem>>, vector<1x32x32xf32>
      %17 = vector.shape_cast %16 : vector<1x32x32xf32> to vector<32x32xf32>
      %18 = vector.extract_strided_slice %17 {offsets = [0, 0], sizes = [32, 16], strides = [1, 1]} : vector<32x32xf32> to vector<32x16xf32>
      %c8_i32 = arith.constant 8 : i32
      %19 = arith.muli %arg2, %c8_i32 : i32
      %20 = tpu.assume_multiple %19, 8 : i32
      %c0_i32_13 = arith.constant 0 : i32
      %c0_i32_14 = arith.constant 0 : i32
      %21 = tpu.memref_slice %arg4[%c0_i32_0, %c0_i32_13, %c0_i32_14] : memref<1x128x32xf32, #tpu.memory_space<vmem>> -> memref<1x128x32xf32, #tpu.memory_space<vmem>>
      %22 = tpu.memref_squeeze %21 : memref<1x128x32xf32, #tpu.memory_space<vmem>> -> memref<128x32xf32, #tpu.memory_space<vmem>>
      %23 = arith.index_cast %20 : i32 to index
      %c0_15 = arith.constant 0 : index
      %24 = vector.load %22[%23, %c0_15] : memref<128x32xf32, #tpu.memory_space<vmem>>, vector<8x32xf32>
      %cst_16 = arith.constant dense<0.000000e+00> : vector<8x16xf32>
      %25 = tpu.matmul %24, %18, %cst_16 {dimension_numbers = #tpu.dot_dimension_numbers<[1], [0], [0], [1], [0, 0, 1, 1], [], []>} : vector<8x32xf32>, vector<32x16xf32>, vector<8x16xf32> -> vector<8x16xf32>
      %c0_17 = arith.constant 0 : index
      %c0_18 = arith.constant 0 : index
      %26 = vector.load %arg7[%c0_17, %c0_18] : memref<8x16xf32, #tpu.memory_space<vmem>>, vector<8x16xf32>
      tpu.vector_store %arg7[%c0_17, %c0_18], %25 {strides = array<i32>} : memref<8x16xf32, #tpu.memory_space<vmem>>, vector<8x16xf32>,
    } else {
    }
    %c0_i32_2 = arith.constant 0 : i32
    %3 = arith.cmpi eq, %arg2, %c0_i32_2 : i32
    %4 = arith.extui %3 : i1 to i32
    %c0_i32_3 = arith.constant 0 : i32
    %c0_i32_4 = arith.constant 0 : i32
    %5 = arith.cmpi ne, %4, %c0_i32_4 : i32
    scf.if %5 {
      %15 = arith.index_cast %arg1 : i32 to index
      %c0_11 = arith.constant 0 : index
      %c0_12 = arith.constant 0 : index
      %16 = vector.load %arg5[%15, %c0_11, %c0_12] : memref<2x32x32xf32, #tpu.memory_space<vmem>>, vector<1x32x32xf32>
      %17 = vector.shape_cast %16 : vector<1x32x32xf32> to vector<32x32xf32>
      %18 = vector.extract_strided_slice %17 {offsets = [0, 16], sizes = [32, 16], strides = [1, 1]} : vector<32x32xf32> to vector<32x16xf32>
      %c128_i32_13 = arith.constant 128 : i32
      %19 = arith.muli %arg3, %c128_i32_13 : i32
      %20 = tpu.assume_multiple %19, 128 : i32
      %c0_i32_14 = arith.constant 0 : i32
      %c0_i32_15 = arith.constant 0 : i32
      %21 = tpu.memref_slice %arg4[%c0_i32_3, %c0_i32_14, %c0_i32_15] : memref<1x128x32xf32, #tpu.memory_space<vmem>> -> memref<1x128x32xf32, #tpu.memory_space<vmem>>
      %22 = tpu.memref_squeeze %21 : memref<1x128x32xf32, #tpu.memory_space<vmem>> -> memref<128x32xf32, #tpu.memory_space<vmem>>
      %23 = arith.index_cast %20 : i32 to index
      %c0_16 = arith.constant 0 : index
      %24 = vector.load %22[%23, %c0_16] : memref<128x32xf32, #tpu.memory_space<vmem>>, vector<128x32xf32>
      %cst_17 = arith.constant dense<0.000000e+00> : vector<128x16xf32>
      %25 = tpu.matmul %24, %18, %cst_17 {dimension_numbers = #tpu.dot_dimension_numbers<[1], [0], [0], [1], [0, 0, 1, 1], [], []>} : vector<128x32xf32>, vector<32x16xf32>, vector<128x16xf32> -> vector<128x16xf32>
      %26 = arith.index_cast %20 : i32 to index
      %c0_18 = arith.constant 0 : index
      %27 = vector.load %arg8[%26, %c0_18] : memref<128x16xf32, #tpu.memory_space<vmem>>, vector<128x16xf32>
      tpu.vector_store %arg8[%26, %c0_18], %25 {strides = array<i32>} : memref<128x16xf32, #tpu.memory_space<vmem>>, vector<128x16xf32>,
    } else {
    }
    %c128_i32 = arith.constant 128 : i32
    %6 = arith.muli %arg3, %c128_i32 : i32
    %7 = tpu.assume_multiple %6, 128 : i32
    %8 = arith.index_cast %7 : i32 to index
    %c0 = arith.constant 0 : index
    %9 = vector.load %arg8[%8, %c0] : memref<128x16xf32, #tpu.memory_space<vmem>>, vector<128x16xf32>
    %c0_5 = arith.constant 0 : index
    %c0_6 = arith.constant 0 : index
    %10 = vector.load %arg7[%c0_5, %c0_6] : memref<8x16xf32, #tpu.memory_space<vmem>>, vector<8x16xf32>
    %cst = arith.constant dense<0.000000e+00> : vector<8x128xf32>
    %11 = tpu.matmul %10, %9, %cst {dimension_numbers = #tpu.dot_dimension_numbers<[1], [1], [0], [0], [0, 0, 1, 0], [], []>} : vector<8x16xf32>, vector<128x16xf32>, vector<8x128xf32> -> vector<8x128xf32>
    %c0_7 = arith.constant 0 : index
    %c0_8 = arith.constant 0 : index
    %c0_9 = arith.constant 0 : index
    %c0_10 = arith.constant 0 : index
    %12 = vector.load %arg6[%c0_7, %c0_8, %c0_9, %c0_10] : memref<1x1x8x128xf32, #tpu.memory_space<vmem>>, vector<1x1x8x128xf32>
    %13 = vector.shape_cast %12 : vector<1x1x8x128xf32> to vector<8x128xf32>
    %14 = vector.shape_cast %11 : vector<8x128xf32> to vector<1x1x8x128xf32>
    tpu.vector_store %arg6[%c0_7, %c0_8, %c0_9, %c0_10], %14 {strides = array<i32>} : memref<1x1x8x128xf32, #tpu.memory_space<vmem>>, vector<1x1x8x128xf32>,
    return
  }
  func.func @transform_0(%arg0: i32, %arg1: i32, %arg2: i32, %arg3: i32) -> (i32, i32, i32) {
    %c0_i32 = arith.constant 0 : i32
    %c0_i32_0 = arith.constant 0 : i32
    %c0_i32_1 = arith.constant 0 : i32
    return %arg0, %c0_i32, %c0_i32_0 : i32, i32, i32
  }
  func.func @transform_1(%arg0: i32, %arg1: i32, %arg2: i32, %arg3: i32) -> (i32, i32, i32) {
    %c0_i32 = arith.constant 0 : i32
    %c0_i32_0 = arith.constant 0 : i32
    %c0_i32_1 = arith.constant 0 : i32
    %c0_i32_2 = arith.constant 0 : i32
    return %c0_i32, %c0_i32_0, %c0_i32_1 : i32, i32, i32
  }
  func.func @transform_2(%arg0: i32, %arg1: i32, %arg2: i32, %arg3: i32) -> (i32, i32, i32, i32) {
    %c0_i32 = arith.constant 0 : i32
    return %arg0, %arg1, %arg2, %arg3 : i32, i32, i32, i32
  }
}

</mosaic_0001>

<bundles_post_ra>
// kernel: tpu_custom_call.1
= control target key start
LH: loop header
LB: loop body
LE: loop exit
PB: predicated region body
PF: predicated region fallthrough
CT: control target
= control target key end

     0   :  { %7 = vsyncpa [#allocation5], 0  ;;  %s1357_s0 = inlined_call_operand.vmem [shape: f32[2,128,32], index: 0, kind: input, shape index: {}]   ;;  %s1358_s1 = inlined_call_operand.vmem [shape: f32[2,32,32], index: 1, kind: input, shape index: {}]   ;;  %s1359_s2 = inlined_call_operand.hbm [shape: f32[2,2,8,128], index: 2, kind: output, shape index: {}]  }
   0x1   :  { %9 = vsyncpa [#allocation5 + $0x1], 0  ;;  %s1128_s9 = smov 0   ;;  %s1130_s10 = smov 0  }
   0x2   :  { %s1132_s11 = smov 0   ;;  %s1134_s12 = smov 0  }
   0x3   :  { %s1136_s13 = smov 0   ;;  %s1138_s14 = smov 0  }
   0x4   :  { %s1140_s15 = smov 0   ;;  %s1142_s16 = smov 0  }
   0x5 LB: > { %s771_s17 = sadd.s32 4294967295, %s1107_s16   ;;  %s772_s18 = sadd.s32 4294967294, %s1107_s16   ;;  %s1107_s16 = sphi %s1142_s16, %s15_s16   ;;  %s1103_s15 = sphi %s1140_s15, %s1368_s15   ;;  %s1099_s14 = sphi %s1138_s14, %s1367_s14   ;;  %s1095_s13 = sphi %s1136_s13, %s1366_s13   ;;  %s1091_s12 = sphi %s1134_s12, %s1365_s12   ;;  %s1087_s11 = sphi %s1132_s11, %s1364_s11   ;;  %s1083_s10 = sphi %s1130_s10, %s1363_s10   ;;  %s1079_s9 = sphi %s1128_s9, %s1362_s9  }
   0x6   : > { %s37_s19 = sadd.s32 1, %s1099_s14  ;;  %s41_s20 = sadd.s32 1, %s1103_s15 }
   0x7   : > { %p39_p0 = scmp.ge.s32.totalorder %s37_s19, 2  ;;  %p111_p1 = scmp.ne.s32.totalorder %s1087_s11, %s1083_s10 }
   0x8   : > { %p112_p2 = scmp.eq.s32.totalorder %s771_s17, 3  ;;  %p117_p5 = scmp.ne.s32.totalorder %s1083_s10, %s1079_s9 }
   0x9   : > { %s1370_s19 = smov (%p39_p0, %s37_s19), 0  ;;  %s1372_s20 = smov (!%p39_p0, %s41_s20), %s1103_s15 }
   0xa   : > { %s93_s21 = ssub.s32 %s1099_s14, %s1370_s19  ;;  %p1179_p3 = por %p112_p2, %p111_p1 }
   0xb   : > { %p43_p4 = scmp.ge.s32.totalorder %s1372_s20, 2  ;;  %p118_p6 = scmp.eq.s32.totalorder %s772_s18, 3 }
   0xc   : > { %p775_p7 = scmp.ge.s32.totalorder %s1107_s16, 1  ;;  %p147_p9 = scmp.lt.s32.totalorder %s1107_s16, 5 }
   0xd   : > { %s1374_s20 = smov (%p43_p4, %s1372_s20), 0  ;;  %p1188_p8 = por %p118_p6, %p117_p5 }
   0xe   : > { %s92_s24 = ssub.s32 %s1103_s15, %s1374_s20  ;;  %s101_s25 = sadd.s32 1, %s1087_s11 }
   0xf   : > { %s94_s26 = sor.u32 %s93_s21, %s92_s24  ;;  %p148_p10 = pnand %p775_p7, %p147_p9 }
  0x10   : > { %p99_p11 = scmp.eq.s32.totalorder %s94_s26, 0  ;;  %s779_s28 = sshll.u32 (!%p148_p10), %s1091_s12, 5 }
  0x11   : > { %151 = sbr.rel (%p148_p10) target bundleno = 649 (0x289), region = 28  ;;  %s179_s3 = scalar_lea.vmem (!%p148_p10), %s1358_s1, %s779_s28 }
  0x12   : > { %s1197_s27 = scalar_select %p99_p11, %s1087_s11, %s101_s25  }
  0x13   : > { %p169_p12 = scmp.lt.s32.totalorder (!%p148_p10), %s1095_s13, 1  ;;  %s1111_s4 = smov (!%p148_p10), 112  }
  0x14   : > { %s166_s18 = sand.u32 (!%p148_p10), 1, %s1083_s10   ;;  %s816_s24 = sshll.u32 (!%p148_p10), %s1095_s13, 1 }
  0x15   : > { %s776_s21 = sshll.u32 (!%p148_p10), %s166_s18, 3  ;;  %s675_s25 = sadd.s32 (!%p148_p10), %s1091_s12, %s816_s24 }
  0x16   : > { %v1109_v0 = vmov 0.0   ;;  %vm1110_vm0 = vmmov 0   ;;  %v272_v1 = vld [vmem:[%s179_s3 + $0x18] sm:$0xff]  ;;  %v270_v2 = vld [vmem:[%s179_s3 + $0x8] sm:$0xff]  ;;  %s170_s5 = scalar_select %p169_p12, %s1095_s13, 1  ;;  %v271_v3 = vld [vmem:[%s179_s3 + $0x10] sm:$0xff] }
  0x17   : > { %863 = vmatprep.subr.mxu1 %v1109_v0  ;;  %871 = vmatprep.mubr.msk.f32.mxu1 %vm1110_vm0, %v1109_v0  ;;  %v269_v4 = vld [vmem:[%s179_s3] sm:$0xff]  ;;  %vm187_vm1 = vcmask 261120   ;;  %vm261_vm2 = vcmask 130048   ;;  %s168_s26 = scalar_lea.vmem [#allocation4], %s776_s21  ;;  %s817_s29 = sshll.u32 %s675_s25, 7 }
  0x18   : > { %906 = vmatprep.subr.mxu0 %v1109_v0  ;;  %938 = vmatprep.mubr.msk.f32.mxu0 %vm1110_vm0, %v1109_v0  ;;  %s820_s6 = sshll.u32 %s170_s5, 7  ;;  %s679_s28 = sshll.u32 %s168_s26, 4  ;;  %s1302_s28 = int_to_ptr.vmem [resolvable:$true] %s679_s28 }
  0x19   : > { %301 = vrot.lane.b32.xlu0 %v272_v1, %s1111_s4  ;;  %297 = vrot.lane.b32.xlu1 %v270_v2, %s1111_s4  ;;  %s1213_s17 = scalar_lea.vmem %s1357_s0, %s820_s6  ;;  %s662_s5 = scalar_lea.sflag [#allocation5], %s166_s18 }
  0x1a   : > { %864 = vmatpush3.msra.mxu1 %v272_v1  ;;  %v186_v5 = vld [vmem:[%s1213_s17] sm:$0xff]  ;;  %v276_v10 = vld [vmem:[%s1213_s17 + $0x8] sm:$0xff]  ;;  %v277_v11 = vld [vmem:[%s1213_s17 + $0x10] sm:$0xff]  ;;  %s1015_s6 = scalar_lea.vmem %s1302_s28, 128  ;;  %s1112_s12 = smov [#allocation4]  }
  0x1b   : > { %865 = vmatprep.subr.mxu1 %v1109_v0  ;;  %v278_v12 = vld [vmem:[%s1213_s17 + $0x18] sm:$0xff]  ;;  %v279_v13 = vld [vmem:[%s1213_s17 + $0x20] sm:$0xff]  ;;  %v280_v14 = vld [vmem:[%s1213_s17 + $0x28] sm:$0xff]  ;;  %p1016_p13 = scmp.ne.s32.totalorder %s1302_s28, %s1015_s6  ;;  %s1019_s13 = sshll.u32 %s1112_s12, 4  ;;  %s1020_s13 = int_to_ptr.vmem [resolvable:$false] %s1019_s13 }
  0x1c   : > { %866 = vmatpush3.msra.mxu1 %v271_v3  ;;  %v281_v15 = vld [vmem:[%s1213_s17 + $0x30] sm:$0xff]  ;;  %v282_v16 = vld [vmem:[%s1213_s17 + $0x38] sm:$0xff]  ;;  %v283_v17 = vld [vmem:[%s1213_s17 + $0x40] sm:$0xff]  ;;  %s1021_s7 = scalar_lea.vmem %s1020_s13, 256  ;;  %p1022_p2 = scmp.lt.s32.totalorder %s1302_s28, %s1020_s13 }
  0x1d   : > { %299 = vrot.lane.b32.xlu0 %v271_v3, %s1111_s4  ;;  %295 = vrot.lane.b32.xlu1 %v269_v4, %s1111_s4  ;;  %v284_v18 = vld [vmem:[%s1213_s17 + $0x48] sm:$0xff]  ;;  %v285_v19 = vld [vmem:[%s1213_s17 + $0x50] sm:$0xff]  ;;  %s1307_s4 = scalar_lea.hbm %s1359_s2, %s817_s29  ;;  %p1017_p0 = pnand %p1016_p13, %p1179_p3 }
  0x1e   : > { %867 = vmatprep.subr.mxu1 %v1109_v0  ;;  %v286_v20 = vld [vmem:[%s1213_s17 + $0x58] sm:$0xff]  ;;  %v287_v21 = vld [vmem:[%s1213_s17 + $0x60] sm:$0xff]  ;;  %v288_v22 = vld [vmem:[%s1213_s17 + $0x68] sm:$0xff]  ;;  %p1023_p4 = scmp.lt.s32.totalorder %s1021_s7, %s1015_s6 }
  0x1f   : > { %868 = vmatpush3.msra.mxu1 %v270_v2  ;;  %v289_v23 = vld [vmem:[%s1213_s17 + $0x70] sm:$0xff]  ;;  %v290_v24 = vld [vmem:[%s1213_s17 + $0x78] sm:$0xff]  ;;  %p1018_p1 = pneg %p1017_p0 }
  0x20   : > { %869 = vmatprep.subr.mxu1 %v1109_v0  ;;  %p1024_p5 = por %p1023_p4, %p1022_p2 }
  0x21   : > { %870 = vmatpush3.msra.mxu1 %v269_v4 }
  0x22   : > { %872 = vmatmul.mubr.msk.f32.vlgmr.msra.gmra.mxu1 %vm187_vm1, %v186_v5  ;;  %p1025_p6 = pnand %p1024_p5, %p1018_p1 }
  0x23   : > { %882 = vmatprep.mubr.msk.f32.mxu1 %vm187_vm1, %v186_v5 }
  0x8b   : > { %v302_v6 = vpop.permute.xlu0 %301  ;;  %v298_v7 = vpop.permute.xlu1 %297 }
  0x8c   : > { %874 = vmatprep.subr.mxu1 %v302_v6 }
  0x8d   : > { %875 = vmatpush3.msra.mxu1 %v302_v6 }
  0x8f   : > { %v300_v8 = vpop.permute.xlu0 %299  ;;  %v296_v9 = vpop.permute.xlu1 %295 }
  0x90   : > { %876 = vmatprep.subr.mxu1 %v300_v8 }
  0x91   : > { %877 = vmatpush3.msra.mxu1 %v300_v8 }
  0x92   : > { %878 = vmatprep.subr.mxu1 %v298_v7 }
  0x93   : > { %879 = vmatpush3.msra.mxu1 %v298_v7 }
  0x94   : > { %880 = vmatprep.subr.mxu1 %v296_v9 }
  0x95   : > { %881 = vmatpush3.msra.mxu1 %v296_v9 }
  0x96   : > { %883 = vmatmul.mubr.msk.f32.vlgmr.msra.gmra.mxu1 %vm187_vm1, %v276_v10 }
  0x97   : > { %885 = vmatprep.mubr.msk.f32.mxu1 %vm187_vm1, %v277_v11 }
  0x9a   : > { %886 = vmatmul.mubr.msk.f32.gmra.mxu1 %vm187_vm1, %v278_v12 }
  0x9b   : > { %888 = vmatprep.mubr.msk.f32.mxu1 %vm187_vm1, %v279_v13 }
  0x9e   : > { %889 = vmatmul.mubr.msk.f32.gmra.mxu1 %vm187_vm1, %v280_v14 }
  0x9f   : > { %891 = vmatprep.mubr.msk.f32.mxu1 %vm187_vm1, %v281_v15 }
  0xa2   : > { %892 = vmatmul.mubr.msk.f32.gmra.mxu1 %vm187_vm1, %v282_v16 }
  0xa3   : > { %894 = vmatprep.mubr.msk.f32.mxu1 %vm187_vm1, %v283_v17 }
  0xa6   : > { %895 = vmatmul.mubr.msk.f32.gmra.mxu1 %vm187_vm1, %v284_v18 }
  0xa7   : > { %897 = vmatprep.mubr.msk.f32.mxu1 %vm187_vm1, %v285_v19 }
  0xaa   : > { %898 = vmatmul.mubr.msk.f32.gmra.mxu1 %vm187_vm1, %v286_v20 }
  0xab   : > { %900 = vmatprep.mubr.msk.f32.mxu1 %vm187_vm1, %v287_v21 }
  0xae   : > { %901 = vmatmul.mubr.msk.f32.gmra.mxu1 %vm187_vm1, %v288_v22 }
  0xaf   : > { %903 = vmatprep.mubr.msk.f32.mxu1 %vm187_vm1, %v289_v23 }
  0xb2   : > { %904 = vmatmul.mubr.msk.f32.gmra.mxu1 %vm187_vm1, %v290_v24 }
  0xe2   : > { %v257_v25 = vpop.f32.mrf.mxu1 }
  0xe3   : > { %262 = vst.msk [vmem:[#allocation2] sm:$0xff] %vm261_vm2, %v257_v25 }
  0xe4   : > { %v873_v26 = vpop.f32.mrf.mxu1 }
  0xea   : > { %v537_v59 = vld [vmem:[#allocation2] sm:$0xff] }
 0x156   : > { %v884_v27 = vpop.f32.mrf.mxu1 }
 0x157   : > { %504 = vst.msk [vmem:[#allocation3 + $0x8] sm:$0xff] %vm261_vm2, %v884_v27 }
 0x158   : > { %v422_v28 = vpop.f32.mrf.mxu1 }
 0x159   : > { %503 = vst.msk [vmem:[#allocation3] sm:$0xff] %vm261_vm2, %v422_v28 }
 0x15a   : > { %v887_v29 = vpop.f32.mrf.mxu1 }
 0x15b   : > { %506 = vst.msk [vmem:[#allocation3 + $0x18] sm:$0xff] %vm261_vm2, %v887_v29 }
 0x15c   : > { %v432_v30 = vpop.f32.mrf.mxu1 }
 0x15d   : > { %505 = vst.msk [vmem:[#allocation3 + $0x10] sm:$0xff] %vm261_vm2, %v432_v30 }
 0x15e   : > { %v890_v31 = vpop.f32.mrf.mxu1  ;;  %v522_v57 = vld [vmem:[#allocation3 + $0x8] sm:$0xff] }
 0x15f   : > { %508 = vst.msk [vmem:[#allocation3 + $0x28] sm:$0xff] %vm261_vm2, %v890_v31 }
 0x160   : > { %v442_v32 = vpop.f32.mrf.mxu1  ;;  %v521_v58 = vld [vmem:[#allocation3] sm:$0xff] }
 0x161   : > { %507 = vst.msk [vmem:[#allocation3 + $0x20] sm:$0xff] %vm261_vm2, %v442_v32 }
 0x162   : > { %v893_v33 = vpop.f32.mrf.mxu1  ;;  %v524_v55 = vld [vmem:[#allocation3 + $0x18] sm:$0xff] }
 0x163   : > { %510 = vst.msk [vmem:[#allocation3 + $0x38] sm:$0xff] %vm261_vm2, %v893_v33 }
 0x164   : > { %v452_v34 = vpop.f32.mrf.mxu1  ;;  %v523_v56 = vld [vmem:[#allocation3 + $0x10] sm:$0xff] }
 0x165   : > { %509 = vst.msk [vmem:[#allocation3 + $0x30] sm:$0xff] %vm261_vm2, %v452_v34 }
 0x166   : > { %v896_v35 = vpop.f32.mrf.mxu1  ;;  %v526_v53 = vld [vmem:[#allocation3 + $0x28] sm:$0xff] }
 0x167   : > { %512 = vst.msk [vmem:[#allocation3 + $0x48] sm:$0xff] %vm261_vm2, %v896_v35 }
 0x168   : > { %v462_v36 = vpop.f32.mrf.mxu1  ;;  %v525_v54 = vld [vmem:[#allocation3 + $0x20] sm:$0xff] }
 0x169   : > { %511 = vst.msk [vmem:[#allocation3 + $0x40] sm:$0xff] %vm261_vm2, %v462_v36 }
 0x16a   : > { %v899_v37 = vpop.f32.mrf.mxu1  ;;  %v528_v51 = vld [vmem:[#allocation3 + $0x38] sm:$0xff] }
 0x16b   : > { %514 = vst.msk [vmem:[#allocation3 + $0x58] sm:$0xff] %vm261_vm2, %v899_v37 }
 0x16c   : > { %v472_v38 = vpop.f32.mrf.mxu1  ;;  %v527_v52 = vld [vmem:[#allocation3 + $0x30] sm:$0xff] }
 0x16d   : > { %513 = vst.msk [vmem:[#allocation3 + $0x50] sm:$0xff] %vm261_vm2, %v472_v38 }
 0x16e   : > { %v902_v39 = vpop.f32.mrf.mxu1  ;;  %v530_v49 = vld [vmem:[#allocation3 + $0x48] sm:$0xff] }
 0x16f   : > { %516 = vst.msk [vmem:[#allocation3 + $0x68] sm:$0xff] %vm261_vm2, %v902_v39 }
 0x170   : > { %v482_v40 = vpop.f32.mrf.mxu1  ;;  %v529_v50 = vld [vmem:[#allocation3 + $0x40] sm:$0xff] }
 0x171   : > { %515 = vst.msk [vmem:[#allocation3 + $0x60] sm:$0xff] %vm261_vm2, %v482_v40 }
 0x172   : > { %v905_v41 = vpop.f32.mrf.mxu1  ;;  %v532_v47 = vld [vmem:[#allocation3 + $0x58] sm:$0xff] }
 0x173   : > { %518 = vst.msk [vmem:[#allocation3 + $0x78] sm:$0xff] %vm261_vm2, %v905_v41 }
 0x174   : > { %v492_v42 = vpop.f32.mrf.mxu1  ;;  %v531_v48 = vld [vmem:[#allocation3 + $0x50] sm:$0xff] }
 0x175   : > { %517 = vst.msk [vmem:[#allocation3 + $0x70] sm:$0xff] %vm261_vm2, %v492_v42 }
 0x176   : > { %v534_v45 = vld [vmem:[#allocation3 + $0x68] sm:$0xff] }
 0x178   : > { %v533_v46 = vld [vmem:[#allocation3 + $0x60] sm:$0xff] }
 0x17a   : > { %v536_v43 = vld [vmem:[#allocation3 + $0x78] sm:$0xff] }
 0x17b   : > { %907 = vmatpush3.xpose.msk.msra.mxu0 %vm261_vm2, %v536_v43 }
 0x17c   : > { %908 = vmatprep.subr.mxu0 %v1109_v0  ;;  %v535_v44 = vld [vmem:[#allocation3 + $0x70] sm:$0xff] }
 0x17f   : > { %909 = vmatpush3.xpose.msk.msra.mxu0 %vm261_vm2, %v535_v44 }
 0x180   : > { %910 = vmatprep.subr.mxu0 %v1109_v0 }
 0x183   : > { %911 = vmatpush3.xpose.msk.msra.mxu0 %vm261_vm2, %v534_v45 }
 0x184   : > { %912 = vmatprep.subr.mxu0 %v1109_v0 }
 0x187   : > { %913 = vmatpush3.xpose.msk.msra.mxu0 %vm261_vm2, %v533_v46 }
 0x188   : > { %914 = vmatprep.subr.mxu0 %v1109_v0 }
 0x18b   : > { %915 = vmatpush3.xpose.msk.msra.mxu0 %vm261_vm2, %v532_v47 }
 0x18c   : > { %916 = vmatprep.subr.mxu0 %v1109_v0 }
 0x18f   : > { %917 = vmatpush3.xpose.msk.msra.mxu0 %vm261_vm2, %v531_v48 }
 0x190   : > { %918 = vmatprep.subr.mxu0 %v1109_v0 }
 0x193   : > { %919 = vmatpush3.xpose.msk.msra.mxu0 %vm261_vm2, %v530_v49 }
 0x194   : > { %920 = vmatprep.subr.mxu0 %v1109_v0 }
 0x197   : > { %921 = vmatpush3.xpose.msk.msra.mxu0 %vm261_vm2, %v529_v50 }
 0x198   : > { %922 = vmatprep.subr.mxu0 %v1109_v0 }
 0x19b   : > { %923 = vmatpush3.xpose.msk.msra.mxu0 %vm261_vm2, %v528_v51 }
 0x19c   : > { %924 = vmatprep.subr.mxu0 %v1109_v0 }
 0x19f   : > { %925 = vmatpush3.xpose.msk.msra.mxu0 %vm261_vm2, %v527_v52 }
 0x1a0   : > { %926 = vmatprep.subr.mxu0 %v1109_v0 }
 0x1a3   : > { %927 = vmatpush3.xpose.msk.msra.mxu0 %vm261_vm2, %v526_v53 }
 0x1a4   : > { %928 = vmatprep.subr.mxu0 %v1109_v0 }
 0x1a7   : > { %929 = vmatpush3.xpose.msk.msra.mxu0 %vm261_vm2, %v525_v54 }
 0x1a8   : > { %930 = vmatprep.subr.mxu0 %v1109_v0 }
 0x1ab   : > { %931 = vmatpush3.xpose.msk.msra.mxu0 %vm261_vm2, %v524_v55 }
 0x1ac   : > { %932 = vmatprep.subr.mxu0 %v1109_v0 }
 0x1af   : > { %933 = vmatpush3.xpose.msk.msra.mxu0 %vm261_vm2, %v523_v56 }
 0x1b0   : > { %934 = vmatprep.subr.mxu0 %v1109_v0 }
 0x1b3   : > { %935 = vmatpush3.xpose.msk.msra.mxu0 %vm261_vm2, %v522_v57 }
 0x1b4   : > { %936 = vmatprep.subr.mxu0 %v1109_v0 }
 0x1b7   : > { %937 = vmatpush3.xpose.msk.msra.mxu0 %vm261_vm2, %v521_v58 }
 0x1ba   : > { %939 = vmatmul.mubr.msk.f32.vlgmr.msra.gmra.mxu0 %vm261_vm2, %v537_v59 }
 0x27a   : > { %v656_v60 = vpop.f32.mrf.mxu0 }
 0x27b   : > { %660 = vst [vmem:[%s168_s26] sm:$0xff] %v656_v60 }
 0x27c   : > { %v940_v61 = vpop.f32.mrf.mxu0 }
 0x27d   : > { %1028 = shalt.err (!%p1025_p6)
}
 0x27e   : > { %s1029_s8 = scalar_lea.hbm %s1307_s4, 128  ;;  %s1033_s21 = scalar_lea.hbm %s1359_s2, 512 }
 0x27f   : > { %p1030_p7 = scmp.ne.s32.totalorder %s1307_s4, %s1029_s8  ;;  %p1034_p11 = scmp.lt.s32.totalorder %s1307_s4, %s1359_s2 }
 0x280   : > { %p1035_p12 = scmp.lt.s32.totalorder %s1033_s21, %s1029_s8 }
 0x281   : > { %p1031_p9 = pnand %p1030_p7, %p1179_p3 }
 0x282   : > { %p1036_p13 = por %p1035_p12, %p1034_p11 }
 0x283   : > { %p1032_p10 = pneg %p1031_p9 }
 0x285   : > { %p1037_p0 = pnand %p1036_p13, %p1032_p10 }
 0x287   : > { %1040 = shalt.err (!%p1037_p0)
}
 0x288   : > { %941 = dma.vmem_to_hbm [thread:$0]  (%p1179_p3), %s1302_s28, 128, %s1307_s4, %s662_s5  }
 0x289 PF: > { %p947_p1 = scmp.ge.s32.totalorder %s1107_s16, 2  ;;  %s691_s26 = sand.u32 1, %s1079_s9  }
 0x28a   : > { %s692_s29 = scalar_lea.sflag [#allocation5], %s691_s26 }
 0x28b   : > { %p944_p2 = pnand %p947_p1, %p1188_p8 }
 0x28d   : > { %p945_p4 = pneg %p944_p2 }
 0x28f   : > { %1074 = dma.done.wait (%p945_p4), %s692_s29, 128  }
 0x290   : > { %1076 = vsyncadd (%p945_p4), %s692_s29, 4294967168  ;;  %s15_s16 = sadd.s32 1, %s1107_s16   ;;  %s1362_s9 = smov %s1083_s10 }
 0x291   : > { %p12_p5 = scmp.ge.s32.totalorder %s15_s16, 6   ;;  %s1363_s10 = smov %s1087_s11 }
 0x292   : > { %s1364_s11 = smov %s1197_s27  ;;  %s1365_s12 = smov %s1099_s14 }
 0x293   : > { %s1366_s13 = smov %s1103_s15  ;;  %s1367_s14 = smov %s1370_s19 }
 0x294   : > { %s1368_s15 = smov %s1374_s20  ;;  %14 = sbr.rel (!%p12_p5) target bundleno = 5 (0x5), region = 77 }
 0x299   :  { %697 = vsyncpa [#allocation5], 1 }
 0x29a   :  { %699 = vsyncpa [#allocation5 + $0x1], 1 }

</bundles_post_ra>
